<compile_context>
chip_gen: v5e
topology: v5e:2x2
jax: 0.10.0
libtpu: 0.0.40
codegen_flags: <defaults>
</compile_context>

<pallas_src>
import math

import jax
import jax.numpy as jnp
from jax.experimental import pallas as pl
from jax.experimental.pallas import tpu as pltpu


# --------------------------------------------------------------------------- #
# Kernels
# --------------------------------------------------------------------------- #
def _copy_kernel(x_ref, o_ref):
    # Straight tile copy: HBM<->VMEM DMA handled by the BlockSpec pipeline.
    o_ref[...] = x_ref[...]


def _alias_noop_kernel(x_ref, o_ref):
    # Output buffer IS the input buffer (input_output_aliases={0: 0}); there is
    # nothing to move.  touch() pins a read+write dep so the call isn't DCE'd.
    del x_ref
    pltpu.touch(o_ref)


# --------------------------------------------------------------------------- #
# Zero-copy aliased path (true nn.Identity semantics)
# --------------------------------------------------------------------------- #
def _identity_alias(x):
    return pl.pallas_call(
        _alias_noop_kernel,
        out_shape=jax.ShapeDtypeStruct(x.shape, x.dtype),
        in_specs=[pl.BlockSpec(memory_space=pl.ANY)],
        out_specs=pl.BlockSpec(memory_space=pl.ANY),
        input_output_aliases={0: 0},
        compiler_params=pltpu.CompilerParams(has_side_effects=True),
        # No CostEstimate: the op moves ~zero bytes, let XLA pack neighbors.
    )(x)


# --------------------------------------------------------------------------- #
# Materialized-copy path
# --------------------------------------------------------------------------- #
def _identity_copy_flat(flat, total, dtype_bytes, target_tile_bytes):
    """1-D tiled copy for element counts that are not a multiple of 128."""
    if total <= 1024:
        # Single block == full array dims (always legal, trivially fits VMEM).
        return pl.pallas_call(
            _copy_kernel,
            out_shape=jax.ShapeDtypeStruct((total,), flat.dtype),
        )(flat)

    # Tiles are multiples of 128 lanes; the final partial block is the only
    # one with masked stores.  Cap the tile so four (in+out, double-buffered)
    # buffers stay small even with 1-D sublane padding.
    max_tile_elems = min(64 * 1024, max(1024, target_tile_bytes // dtype_bytes))
    lane_total = (total // 128) * 128
    tile = min(lane_total, (max_tile_elems // 1024) * 1024)
    tile = max(tile, 1024)
    grid = (pl.cdiv(total, tile),)

    return pl.pallas_call(
        _copy_kernel,
        out_shape=jax.ShapeDtypeStruct((total,), flat.dtype),
        grid_spec=pltpu.PrefetchScalarGridSpec(
            num_scalar_prefetch=0,
            grid=grid,
            in_specs=[pl.BlockSpec((tile,), lambda i: (i,))],
            out_specs=pl.BlockSpec((tile,), lambda i: (i,)),
        ),
        compiler_params=pltpu.CompilerParams(dimension_semantics=("arbitrary",)),
        cost_estimate=pl.CostEstimate(
            flops=0, transcendentals=0, bytes_accessed=2 * total * dtype_bytes),
    )(flat)


def _identity_copy(x, *, target_tile_bytes, max_lane):
    orig_shape = x.shape
    total = math.prod(orig_shape) if orig_shape else 1
    if total == 0:
        return x
    dtype_bytes = jnp.dtype(x.dtype).itemsize

    # Lane-dense 2-D view: cols = largest 128 * 2**k dividing the element
    # count (capped at max_lane).  This is a reshape of the contiguous
    # row-major buffer (free, no transpose), so every store is a full-lane
    # unmasked vst.
    cols = 0
    c = 128
    while c <= max_lane and total % c == 0:
        cols = c
        c *= 2

    if cols == 0:
        # Element count not a multiple of 128 (rare): tiled 1-D fallback.
        out = _identity_copy_flat(x.reshape(total), total, dtype_bytes,
                                  target_tile_bytes)
        return out.reshape(orig_shape)

    rows = total // cols
    x2 = x.reshape(rows, cols)

    # Sublane-packing multiple for this dtype: 8 (32-bit), 16 (bf16), 32 (int8).
    sub = 8 * max(1, 4 // dtype_bytes)

    if rows <= sub:
        tile_rows = rows            # single block == full array dims (small arrays)
        grid_rows = 1
    else:
        # ~target_tile_bytes per tile, rounded to the sublane multiple, but at
        # least ~4 grid steps so both v7x TensorCores get work and the DMA
        # pipeline has something to overlap.
        target_rows = max(
            sub, (target_tile_bytes // (cols * dtype_bytes)) // sub * sub)
        quarter = ((rows + 3) // 4 + sub - 1) // sub * sub
        tile_rows = max(sub, min(target_rows, quarter))
        grid_rows = pl.cdiv(rows, tile_rows)   # partial last block is masked

    cost = pl.CostEstimate(
        flops=0, transcendentals=0, bytes_accessed=2 * total * dtype_bytes)

    out = pl.pallas_call(
        _copy_kernel,
        out_shape=jax.ShapeDtypeStruct((rows, cols), x.dtype),
        grid_spec=pltpu.PrefetchScalarGridSpec(
            num_scalar_prefetch=0,
            grid=(grid_rows,),
            in_specs=[pl.BlockSpec((tile_rows, cols), lambda i: (i, 0))],
            out_specs=pl.BlockSpec((tile_rows, cols), lambda i: (i, 0)),
        ),
        compiler_params=pltpu.CompilerParams(
            # Independent row tiles -> sharded across v7x's two TensorCores
            # (no-op on v5e/v6e).  4 x ~2 MiB buffers stay far below the
            # default scoped-VMEM limit on all generations, so no explicit
            # vmem_limit_bytes is needed.
            dimension_semantics=("parallel",),
        ),
        cost_estimate=cost,
    )(x2)
    return out.reshape(orig_shape)


# --------------------------------------------------------------------------- #
# Public wrapper
# --------------------------------------------------------------------------- #
def identity(x, *, donate=True, target_tile_bytes=2 * 1024 * 1024, max_lane=4096):
    """Pallas identity: returns an array equal to `x` (any shape / dtype).

    donate=True  -> zero-copy aliased no-op (output aliases the input buffer,
                    no HBM traffic); falls back to the copy path if the aliased
                    lowering is unavailable.
    donate=False -> materialized copy into a distinct output buffer.
    """
    if donate:
        try:
            return _identity_alias(x)
        except Exception:
            # Conservative fallback: identical semantics via an explicit copy.
            pass
    return _identity_copy(x, target_tile_bytes=target_tile_bytes,
                          max_lane=max_lane)


if __name__ == "__main__":
    key = jax.random.PRNGKey(0)
    N, C, H, W = 2, 4, 16, 16
    x = jax.random.normal(key, (N, C, H, W), dtype=jnp.float32)

    # 1) Zero-copy aliased path (faithful nn.Identity semantics).
    out = jax.block_until_ready(identity(x))
    assert out.shape == x.shape and out.dtype == x.dtype
    assert jnp.array_equal(out, x), "mismatch (aliased path)"

    # 2) Materialized-copy path (distinct output buffer).
    out_copy = jax.block_until_ready(identity(x, donate=False))
    assert jnp.array_equal(out_copy, x), "mismatch (copy path)"

    # 3) bf16 exercises the dtype-aware sublane rounding in the copy path.
    xb = x.astype(jnp.bfloat16)
    out_b = jax.block_until_ready(identity(xb, donate=False))
    assert out_b.dtype == xb.dtype and jnp.array_equal(out_b, xb), "mismatch (bf16)"

    # 4) Element count not a multiple of 128 exercises the flat fallback.
    x_odd = jax.random.normal(jax.random.PRNGKey(1), (3, 5, 7), dtype=jnp.float32)
    out_odd = jax.block_until_ready(identity(x_odd, donate=False))
    assert jnp.array_equal(out_odd, x_odd), "mismatch (non-128 fallback)"

    print("KERNEL_OK")
</pallas_src>

<mosaic_0001>
module attributes {stable_mosaic.version = 11 : i64} {
  func.func @_alias_noop_kernel(%arg0: memref<2x4x16x16xf32, #tpu.memory_space<any>>, %arg1: memref<2x4x16x16xf32, #tpu.memory_space<any>>) attributes {dimension_semantics = [], scalar_prefetch = 0 : i64, scratch_operands = 0 : i64, tpu.core_type = #tpu.core_type<tc>} {
    return
  }
}

module attributes {stable_mosaic.version = 11 : i64} {
  func.func @_copy_kernel(%arg0: i32, %arg1: memref<1x2048xf32, #tpu.memory_space<vmem>>, %arg2: memref<1x2048xf32, #tpu.memory_space<vmem>>) attributes {dimension_semantics = [#tpu.dimension_semantics<parallel>], iteration_bounds = array<i64: 1>, scalar_prefetch = 0 : i64, scratch_operands = 0 : i64, tpu.core_type = #tpu.core_type<tc>, window_params = [{transform_indices = @transform_0, window_bounds = array<i64: 1, 2048>}, {transform_indices = @transform_1, window_bounds = array<i64: 1, 2048>}]} {
    %c0 = arith.constant 0 : index
    %c0_0 = arith.constant 0 : index
    %0 = vector.load %arg1[%c0, %c0_0] : memref<1x2048xf32, #tpu.memory_space<vmem>>, vector<1x2048xf32>
    %c0_1 = arith.constant 0 : index
    %c0_2 = arith.constant 0 : index
    %1 = vector.load %arg2[%c0_1, %c0_2] : memref<1x2048xf32, #tpu.memory_space<vmem>>, vector<1x2048xf32>
    tpu.vector_store %arg2[%c0_1, %c0_2], %0 {strides = array<i32>} : memref<1x2048xf32, #tpu.memory_space<vmem>>, vector<1x2048xf32>,
    return
  }
  func.func @transform_0(%arg0: i32) -> (i32, i32) {
    %c0_i32 = arith.constant 0 : i32
    %c0_i32_0 = arith.constant 0 : i32
    return %arg0, %c0_i32 : i32, i32
  }
  func.func @transform_1(%arg0: i32) -> (i32, i32) {
    %c0_i32 = arith.constant 0 : i32
    %c0_i32_0 = arith.constant 0 : i32
    return %arg0, %c0_i32 : i32, i32
  }
}

</mosaic_0001>

<bundles_post_ra>
// kernel: tpu_custom_call.1
= control target key start
LH: loop header
LB: loop body
LE: loop exit
PB: predicated region body
PF: predicated region fallthrough
CT: control target
= control target key end

     0   :  { %s16_s0 = inlined_call_operand.hbm [shape: f32[2,4,16,16], index: 0, kind: input, shape index: {}, may-alias: {0,1}]   ;;  %s17_s1 = inlined_call_operand.hbm [shape: f32[2,4,16,16], index: 1, kind: output, shape index: {}, may-alias: {0,1}]  }

// kernel: tpu_custom_call.1
= control target key start
LH: loop header
LB: loop body
LE: loop exit
PB: predicated region body
PF: predicated region fallthrough
CT: control target
= control target key end

     0   :  { %6 = vsyncpa [#allocation3], 0  ;;  %s116_s0 = inlined_call_operand.hbm [shape: f32[1,2048], index: 0, kind: input, shape index: {}]   ;;  %s117_s1 = inlined_call_operand.hbm [shape: f32[1,2048], index: 1, kind: output, shape index: {}]  }
   0x1   :  { %7 = vsyncpa [#allocation4], 0  ;;  %s13_s8 = sshll.u32 %s116_s0, 4  ;;  %s98_s9 = smov [#allocation2]   ;;  %s14_s8 = int_to_ptr.hbm [resolvable:$true] %s13_s8 }
   0x2   :  { %s15_s10 = sshll.u32 %s98_s9, 4  ;;  %s16_s10 = int_to_ptr.vmem [resolvable:$true] %s15_s10 }
   0x3   :  { %18 = dma.hbm_to_vmem [thread:$0]  %s14_s8, 256, %s16_s10, [#allocation3]  }
   0x4   :  { %94 = dma.done.wait [#allocation3], 256  }
   0x5   :  { %95 = vsyncadd [#allocation3], 4294967040  ;;  %s99_s11 = smov [#allocation5]   ;;  %s34_s15 = sshll.u32 %s117_s1, 4  ;;  %v23_v0 = vld [vmem:[#allocation2] sm:$0xff]  ;;  %v24_v1 = vld [vmem:[#allocation2 + $0x8] sm:$0xff]  ;;  %s35_s15 = int_to_ptr.hbm [resolvable:$true] %s34_s15 }
   0x6   :  { %s32_s12 = sshll.u32 %s99_s11, 4  ;;  %25 = vst [vmem:[#allocation5] sm:$0xff] %v23_v0  ;;  %s33_s12 = int_to_ptr.vmem [resolvable:$true] %s32_s12 }
   0x7   :  { %26 = vst [vmem:[#allocation5 + $0x8] sm:$0xff] %v24_v1 }
   0x8   :  { %37 = dma.vmem_to_hbm [thread:$0]  %s33_s12, 256, %s35_s15, [#allocation4]  }
   0x9   :  { %96 = dma.done.wait [#allocation4], 256  }
   0xa   :  { %97 = vsyncadd [#allocation4], 4294967040 }
   0xb   :  { %42 = vsyncpa [#allocation3], 1 }
   0xc   :  { %43 = vsyncpa [#allocation4], 1 }

</bundles_post_ra>
